<compile_context>
chip_gen: v5e
topology: v5e:2x2
jax: 0.10.0
libtpu: 0.0.40
codegen_flags: <defaults>
</compile_context>

<pallas_src>
import functools
import math

import jax
import jax.numpy as jnp
from jax.experimental import pallas as pl
from jax.experimental.pallas import tpu as pltpu


def _round_up(x, m):
    return ((x + m - 1) // m) * m


def _token_embedding_kernel(ids_ref, table_ref, out_ref, rows_vmem, sems,
                            *, scale, tile_tokens, depth):
    # ids_ref:    SMEM (n_pad,) int32  -- scalar-prefetched flat token ids
    # table_ref:  (vocab, emb) raw HBM ref (memory_space=pl.ANY)
    # out_ref:    (T, emb) VMEM output block
    # rows_vmem:  (T, emb) VMEM scratch -- DMA gather destination
    # sems:       DMA semaphore ring of size `depth`
    base = pl.program_id(0) * tile_tokens

    def row_copy(t, slot):
        row = ids_ref[base + t]
        return pltpu.make_async_copy(
            table_ref.at[pl.ds(row, 1)],      # (1, emb) row in HBM
            rows_vmem.at[pl.ds(t, 1)],        # (1, emb) row in VMEM scratch
            sems.at[slot],
        )

    # Prime the ring: `depth` row fetches in flight hide HBM latency.
    for t in range(depth):
        row_copy(t, t).start()

    @pl.loop(0, tile_tokens)
    def _(t):
        slot = t % depth
        row_copy(t, slot).wait()

        @pl.when(t + depth < tile_tokens)
        def _():
            row_copy(t + depth, slot).start()

    out_ref[...] = (rows_vmem[...] * scale).astype(out_ref.dtype)


def token_embedding(tokens, emb_table, *, tile_tokens=256, dma_depth=8):
    """tokens: [len, batch] int, emb_table: [vocab, emb] f32 ->
    [len, batch, emb] f32 (== nn.Embedding(tokens) * sqrt(emb_size))."""
    L, B = tokens.shape
    vocab, emb = emb_table.shape
    n = L * B
    scale = math.sqrt(emb)

    # Token tile size: multiple of 8 sublanes, capped by tile_tokens.
    T = _round_up(min(tile_tokens, _round_up(n, 8)), 8)
    n_pad = _round_up(n, T)
    depth = max(1, min(dma_depth, T))

    # Flat ids for SMEM scalar prefetch; clamp OOB (nn.Embedding would raise).
    flat_ids = jnp.clip(tokens.reshape(n).astype(jnp.int32), 0, vocab - 1)
    if n_pad != n:
        flat_ids = jnp.pad(flat_ids, (0, n_pad - n))

    itemsize = jnp.dtype(emb_table.dtype).itemsize
    # scratch (1x) + double-buffered output block (2x) + slack.
    vmem_needed = 4 * T * emb * itemsize + (1 << 20)
    vmem_limit = min(max(vmem_needed, 16 << 20), 48 << 20)

    out_flat = pl.pallas_call(
        functools.partial(_token_embedding_kernel, scale=scale,
                          tile_tokens=T, depth=depth),
        out_shape=jax.ShapeDtypeStruct((n_pad, emb), emb_table.dtype),
        grid_spec=pltpu.PrefetchScalarGridSpec(
            num_scalar_prefetch=1,
            grid=(n_pad // T,),
            in_specs=[
                # Table stays in HBM; rows are gathered by manual DMA.
                pl.BlockSpec(memory_space=pl.ANY),
            ],
            # Last dim equals the full array dim -> legal even if emb % 128 != 0,
            # and no lane-padding write amplification.
            out_specs=pl.BlockSpec((T, emb), lambda i, ids: (i, 0)),
            scratch_shapes=[
                pltpu.VMEM((T, emb), emb_table.dtype),
                pltpu.SemaphoreType.DMA((depth,)),
            ],
        ),
        compiler_params=pltpu.CompilerParams(
            dimension_semantics=("parallel",),
            vmem_limit_bytes=vmem_limit,
        ),
    )(flat_ids, emb_table)

    return out_flat[:n].reshape(L, B, emb)


if __name__ == "__main__":
    # Small, deterministic problem: len=8, batch=2, vocab=64, emb=32.
    seq_len, batch, vocab_size, emb_size = 8, 2, 64, 32

    key = jax.random.PRNGKey(0)
    k_tok, k_emb = jax.random.split(key)

    tokens = jax.random.randint(
        k_tok, (seq_len, batch), minval=0, maxval=vocab_size, dtype=jnp.int32)
    # Deterministic "weights" for nn.Embedding(vocab_size, emb_size).
    emb_table = jax.random.normal(k_emb, (vocab_size, emb_size), jnp.float32)

    out = token_embedding(tokens, emb_table)
    out = jax.block_until_ready(out)

    # Reference: plain JAX embedding lookup * sqrt(emb_size).
    ref = jnp.take(emb_table, tokens, axis=0) * math.sqrt(emb_size)

    assert out.shape == (seq_len, batch, emb_size)
    assert jnp.allclose(out, ref, atol=1e-6, rtol=1e-6)
    print("KERNEL_OK")
</pallas_src>

<mosaic_0001>
module attributes {stable_mosaic.version = 11 : i64} {
  func.func @_token_embedding_kernel(%arg0: i32, %arg1: memref<16xi32, #tpu.memory_space<smem>>, %arg2: memref<64x32xf32, #tpu.memory_space<any>>, %arg3: memref<16x32xf32, #tpu.memory_space<vmem>>, %arg4: memref<16x32xf32, #tpu.memory_space<vmem>>, %arg5: memref<8x!tpu.dma_semaphore, #tpu.memory_space<semaphore_mem>>) attributes {dimension_semantics = [#tpu.dimension_semantics<parallel>], iteration_bounds = array<i64: 1>, scalar_prefetch = 1 : i64, scratch_operands = 2 : i64, tpu.core_type = #tpu.core_type<tc>, window_params = [{}, {transform_indices = @transform_1, window_bounds = array<i64: 16, 32>}]} {
    %c16_i32 = arith.constant 16 : i32
    %0 = arith.muli %arg0, %c16_i32 : i32
    %c0_i32 = arith.constant 0 : i32
    %1 = arith.addi %0, %c0_i32 : i32
    %2 = arith.index_cast %1 : i32 to index
    %3 = memref.load %arg1[%2] : memref<16xi32, #tpu.memory_space<smem>>
    %c0_i32_0 = arith.constant 0 : i32
    %c0_i32_1 = arith.constant 0 : i32
    %4 = tpu.memref_slice %arg2[%3, %c0_i32_1] : memref<64x32xf32, #tpu.memory_space<any>> -> memref<1x32xf32, #tpu.memory_space<any>>
    %c0_i32_2 = arith.constant 0 : i32
    %c0_i32_3 = arith.constant 0 : i32
    %5 = tpu.memref_slice %arg4[%c0_i32_2, %c0_i32_3] : memref<16x32xf32, #tpu.memory_space<vmem>> -> memref<1x32xf32, #tpu.memory_space<vmem>>
    %6 = tpu.memref_slice %arg5[%c0_i32_0] : memref<8x!tpu.dma_semaphore, #tpu.memory_space<semaphore_mem>> -> memref<1x!tpu.dma_semaphore, #tpu.memory_space<semaphore_mem>>
    %7 = tpu.memref_squeeze %6 : memref<1x!tpu.dma_semaphore, #tpu.memory_space<semaphore_mem>> -> memref<!tpu.dma_semaphore, #tpu.memory_space<semaphore_mem>>
    tpu.enqueue_dma source(%4 : memref<1x32xf32, #tpu.memory_space<any>>) target(%5 : memref<1x32xf32, #tpu.memory_space<vmem>>) target_semaphore(%7 : memref<!tpu.dma_semaphore, #tpu.memory_space<semaphore_mem>>)
    %c1_i32 = arith.constant 1 : i32
    %8 = arith.addi %0, %c1_i32 : i32
    %9 = arith.index_cast %8 : i32 to index
    %10 = memref.load %arg1[%9] : memref<16xi32, #tpu.memory_space<smem>>
    %c1_i32_4 = arith.constant 1 : i32
    %c0_i32_5 = arith.constant 0 : i32
    %11 = tpu.memref_slice %arg2[%10, %c0_i32_5] : memref<64x32xf32, #tpu.memory_space<any>> -> memref<1x32xf32, #tpu.memory_space<any>>
    %c1_i32_6 = arith.constant 1 : i32
    %c0_i32_7 = arith.constant 0 : i32
    %12 = tpu.memref_slice %arg4[%c1_i32_6, %c0_i32_7] : memref<16x32xf32, #tpu.memory_space<vmem>> -> memref<1x32xf32, #tpu.memory_space<vmem>>
    %13 = tpu.memref_slice %arg5[%c1_i32_4] : memref<8x!tpu.dma_semaphore, #tpu.memory_space<semaphore_mem>> -> memref<1x!tpu.dma_semaphore, #tpu.memory_space<semaphore_mem>>
    %14 = tpu.memref_squeeze %13 : memref<1x!tpu.dma_semaphore, #tpu.memory_space<semaphore_mem>> -> memref<!tpu.dma_semaphore, #tpu.memory_space<semaphore_mem>>
    tpu.enqueue_dma source(%11 : memref<1x32xf32, #tpu.memory_space<any>>) target(%12 : memref<1x32xf32, #tpu.memory_space<vmem>>) target_semaphore(%14 : memref<!tpu.dma_semaphore, #tpu.memory_space<semaphore_mem>>)
    %c2_i32 = arith.constant 2 : i32
    %15 = arith.addi %0, %c2_i32 : i32
    %16 = arith.index_cast %15 : i32 to index
    %17 = memref.load %arg1[%16] : memref<16xi32, #tpu.memory_space<smem>>
    %c2_i32_8 = arith.constant 2 : i32
    %c0_i32_9 = arith.constant 0 : i32
    %18 = tpu.memref_slice %arg2[%17, %c0_i32_9] : memref<64x32xf32, #tpu.memory_space<any>> -> memref<1x32xf32, #tpu.memory_space<any>>
    %c2_i32_10 = arith.constant 2 : i32
    %c0_i32_11 = arith.constant 0 : i32
    %19 = tpu.memref_slice %arg4[%c2_i32_10, %c0_i32_11] : memref<16x32xf32, #tpu.memory_space<vmem>> -> memref<1x32xf32, #tpu.memory_space<vmem>>
    %20 = tpu.memref_slice %arg5[%c2_i32_8] : memref<8x!tpu.dma_semaphore, #tpu.memory_space<semaphore_mem>> -> memref<1x!tpu.dma_semaphore, #tpu.memory_space<semaphore_mem>>
    %21 = tpu.memref_squeeze %20 : memref<1x!tpu.dma_semaphore, #tpu.memory_space<semaphore_mem>> -> memref<!tpu.dma_semaphore, #tpu.memory_space<semaphore_mem>>
    tpu.enqueue_dma source(%18 : memref<1x32xf32, #tpu.memory_space<any>>) target(%19 : memref<1x32xf32, #tpu.memory_space<vmem>>) target_semaphore(%21 : memref<!tpu.dma_semaphore, #tpu.memory_space<semaphore_mem>>)
    %c3_i32 = arith.constant 3 : i32
    %22 = arith.addi %0, %c3_i32 : i32
    %23 = arith.index_cast %22 : i32 to index
    %24 = memref.load %arg1[%23] : memref<16xi32, #tpu.memory_space<smem>>
    %c3_i32_12 = arith.constant 3 : i32
    %c0_i32_13 = arith.constant 0 : i32
    %25 = tpu.memref_slice %arg2[%24, %c0_i32_13] : memref<64x32xf32, #tpu.memory_space<any>> -> memref<1x32xf32, #tpu.memory_space<any>>
    %c3_i32_14 = arith.constant 3 : i32
    %c0_i32_15 = arith.constant 0 : i32
    %26 = tpu.memref_slice %arg4[%c3_i32_14, %c0_i32_15] : memref<16x32xf32, #tpu.memory_space<vmem>> -> memref<1x32xf32, #tpu.memory_space<vmem>>
    %27 = tpu.memref_slice %arg5[%c3_i32_12] : memref<8x!tpu.dma_semaphore, #tpu.memory_space<semaphore_mem>> -> memref<1x!tpu.dma_semaphore, #tpu.memory_space<semaphore_mem>>
    %28 = tpu.memref_squeeze %27 : memref<1x!tpu.dma_semaphore, #tpu.memory_space<semaphore_mem>> -> memref<!tpu.dma_semaphore, #tpu.memory_space<semaphore_mem>>
    tpu.enqueue_dma source(%25 : memref<1x32xf32, #tpu.memory_space<any>>) target(%26 : memref<1x32xf32, #tpu.memory_space<vmem>>) target_semaphore(%28 : memref<!tpu.dma_semaphore, #tpu.memory_space<semaphore_mem>>)
    %c4_i32 = arith.constant 4 : i32
    %29 = arith.addi %0, %c4_i32 : i32
    %30 = arith.index_cast %29 : i32 to index
    %31 = memref.load %arg1[%30] : memref<16xi32, #tpu.memory_space<smem>>
    %c4_i32_16 = arith.constant 4 : i32
    %c0_i32_17 = arith.constant 0 : i32
    %32 = tpu.memref_slice %arg2[%31, %c0_i32_17] : memref<64x32xf32, #tpu.memory_space<any>> -> memref<1x32xf32, #tpu.memory_space<any>>
    %c4_i32_18 = arith.constant 4 : i32
    %c0_i32_19 = arith.constant 0 : i32
    %33 = tpu.memref_slice %arg4[%c4_i32_18, %c0_i32_19] : memref<16x32xf32, #tpu.memory_space<vmem>> -> memref<1x32xf32, #tpu.memory_space<vmem>>
    %34 = tpu.memref_slice %arg5[%c4_i32_16] : memref<8x!tpu.dma_semaphore, #tpu.memory_space<semaphore_mem>> -> memref<1x!tpu.dma_semaphore, #tpu.memory_space<semaphore_mem>>
    %35 = tpu.memref_squeeze %34 : memref<1x!tpu.dma_semaphore, #tpu.memory_space<semaphore_mem>> -> memref<!tpu.dma_semaphore, #tpu.memory_space<semaphore_mem>>
    tpu.enqueue_dma source(%32 : memref<1x32xf32, #tpu.memory_space<any>>) target(%33 : memref<1x32xf32, #tpu.memory_space<vmem>>) target_semaphore(%35 : memref<!tpu.dma_semaphore, #tpu.memory_space<semaphore_mem>>)
    %c5_i32 = arith.constant 5 : i32
    %36 = arith.addi %0, %c5_i32 : i32
    %37 = arith.index_cast %36 : i32 to index
    %38 = memref.load %arg1[%37] : memref<16xi32, #tpu.memory_space<smem>>
    %c5_i32_20 = arith.constant 5 : i32
    %c0_i32_21 = arith.constant 0 : i32
    %39 = tpu.memref_slice %arg2[%38, %c0_i32_21] : memref<64x32xf32, #tpu.memory_space<any>> -> memref<1x32xf32, #tpu.memory_space<any>>
    %c5_i32_22 = arith.constant 5 : i32
    %c0_i32_23 = arith.constant 0 : i32
    %40 = tpu.memref_slice %arg4[%c5_i32_22, %c0_i32_23] : memref<16x32xf32, #tpu.memory_space<vmem>> -> memref<1x32xf32, #tpu.memory_space<vmem>>
    %41 = tpu.memref_slice %arg5[%c5_i32_20] : memref<8x!tpu.dma_semaphore, #tpu.memory_space<semaphore_mem>> -> memref<1x!tpu.dma_semaphore, #tpu.memory_space<semaphore_mem>>
    %42 = tpu.memref_squeeze %41 : memref<1x!tpu.dma_semaphore, #tpu.memory_space<semaphore_mem>> -> memref<!tpu.dma_semaphore, #tpu.memory_space<semaphore_mem>>
    tpu.enqueue_dma source(%39 : memref<1x32xf32, #tpu.memory_space<any>>) target(%40 : memref<1x32xf32, #tpu.memory_space<vmem>>) target_semaphore(%42 : memref<!tpu.dma_semaphore, #tpu.memory_space<semaphore_mem>>)
    %c6_i32 = arith.constant 6 : i32
    %43 = arith.addi %0, %c6_i32 : i32
    %44 = arith.index_cast %43 : i32 to index
    %45 = memref.load %arg1[%44] : memref<16xi32, #tpu.memory_space<smem>>
    %c6_i32_24 = arith.constant 6 : i32
    %c0_i32_25 = arith.constant 0 : i32
    %46 = tpu.memref_slice %arg2[%45, %c0_i32_25] : memref<64x32xf32, #tpu.memory_space<any>> -> memref<1x32xf32, #tpu.memory_space<any>>
    %c6_i32_26 = arith.constant 6 : i32
    %c0_i32_27 = arith.constant 0 : i32
    %47 = tpu.memref_slice %arg4[%c6_i32_26, %c0_i32_27] : memref<16x32xf32, #tpu.memory_space<vmem>> -> memref<1x32xf32, #tpu.memory_space<vmem>>
    %48 = tpu.memref_slice %arg5[%c6_i32_24] : memref<8x!tpu.dma_semaphore, #tpu.memory_space<semaphore_mem>> -> memref<1x!tpu.dma_semaphore, #tpu.memory_space<semaphore_mem>>
    %49 = tpu.memref_squeeze %48 : memref<1x!tpu.dma_semaphore, #tpu.memory_space<semaphore_mem>> -> memref<!tpu.dma_semaphore, #tpu.memory_space<semaphore_mem>>
    tpu.enqueue_dma source(%46 : memref<1x32xf32, #tpu.memory_space<any>>) target(%47 : memref<1x32xf32, #tpu.memory_space<vmem>>) target_semaphore(%49 : memref<!tpu.dma_semaphore, #tpu.memory_space<semaphore_mem>>)
    %c7_i32 = arith.constant 7 : i32
    %50 = arith.addi %0, %c7_i32 : i32
    %51 = arith.index_cast %50 : i32 to index
    %52 = memref.load %arg1[%51] : memref<16xi32, #tpu.memory_space<smem>>
    %c7_i32_28 = arith.constant 7 : i32
    %c0_i32_29 = arith.constant 0 : i32
    %53 = tpu.memref_slice %arg2[%52, %c0_i32_29] : memref<64x32xf32, #tpu.memory_space<any>> -> memref<1x32xf32, #tpu.memory_space<any>>
    %c7_i32_30 = arith.constant 7 : i32
    %c0_i32_31 = arith.constant 0 : i32
    %54 = tpu.memref_slice %arg4[%c7_i32_30, %c0_i32_31] : memref<16x32xf32, #tpu.memory_space<vmem>> -> memref<1x32xf32, #tpu.memory_space<vmem>>
    %55 = tpu.memref_slice %arg5[%c7_i32_28] : memref<8x!tpu.dma_semaphore, #tpu.memory_space<semaphore_mem>> -> memref<1x!tpu.dma_semaphore, #tpu.memory_space<semaphore_mem>>
    %56 = tpu.memref_squeeze %55 : memref<1x!tpu.dma_semaphore, #tpu.memory_space<semaphore_mem>> -> memref<!tpu.dma_semaphore, #tpu.memory_space<semaphore_mem>>
    tpu.enqueue_dma source(%53 : memref<1x32xf32, #tpu.memory_space<any>>) target(%54 : memref<1x32xf32, #tpu.memory_space<vmem>>) target_semaphore(%56 : memref<!tpu.dma_semaphore, #tpu.memory_space<semaphore_mem>>)
    %c0_i32_32 = arith.constant 0 : i32
    %c16_i32_33 = arith.constant 16 : i32
    %57 = arith.addi %c0_i32_32, %c16_i32_33 : i32
    %c1_i32_34 = arith.constant 1 : i32
    scf.for %arg6 = %c0_i32_32 to %57 step %c1_i32_34  : i32 {
      %c1_i32_39 = arith.constant 1 : i32
      %62 = arith.muli %arg6, %c1_i32_39 : i32
      %c0_i32_40 = arith.constant 0 : i32
      %63 = arith.addi %c0_i32_40, %62 : i32
      %c8_i32 = arith.constant 8 : i32
      %c0_i32_41 = arith.constant 0 : i32
      %64 = arith.cmpi eq, %c8_i32, %c0_i32_41 : i32
      %c1_i32_42 = arith.constant 1 : i32
      %65 = arith.select %64, %c1_i32_42, %c8_i32 : i32
      %66 = arith.remsi %63, %65 : i32
      %c0_i32_43 = arith.constant 0 : i32
      %67 = arith.cmpi ne, %66, %c0_i32_43 : i32
      %c0_i32_44 = arith.constant 0 : i32
      %68 = arith.cmpi slt, %66, %c0_i32_44 : i32
      %c0_i32_45 = arith.constant 0 : i32
      %69 = arith.cmpi slt, %65, %c0_i32_45 : i32
      %70 = arith.xori %68, %69 : i1
      %71 = arith.andi %70, %67 : i1
      %72 = arith.addi %66, %65 : i32
      %73 = arith.select %71, %72, %66 : i32
      %74 = arith.addi %0, %63 : i32
      %75 = arith.index_cast %74 : i32 to index
      %76 = memref.load %arg1[%75] : memref<16xi32, #tpu.memory_space<smem>>
      %c0_i32_46 = arith.constant 0 : i32
      %77 = tpu.memref_slice %arg2[%76, %c0_i32_46] : memref<64x32xf32, #tpu.memory_space<any>> -> memref<1x32xf32, #tpu.memory_space<any>>
      %c0_i32_47 = arith.constant 0 : i32
      %78 = tpu.memref_slice %arg4[%63, %c0_i32_47] : memref<16x32xf32, #tpu.memory_space<vmem>> -> memref<1x32xf32, #tpu.memory_space<vmem>>
      %79 = tpu.memref_slice %arg5[%73] : memref<8x!tpu.dma_semaphore, #tpu.memory_space<semaphore_mem>> -> memref<1x!tpu.dma_semaphore, #tpu.memory_space<semaphore_mem>>
      %80 = tpu.memref_squeeze %79 : memref<1x!tpu.dma_semaphore, #tpu.memory_space<semaphore_mem>> -> memref<!tpu.dma_semaphore, #tpu.memory_space<semaphore_mem>>
      tpu.wait_dma2 semaphore(%80 : memref<!tpu.dma_semaphore, #tpu.memory_space<semaphore_mem>>) src(%77 : memref<1x32xf32, #tpu.memory_space<any>>) dst(%78 : memref<1x32xf32, #tpu.memory_space<vmem>>)
      %c8_i32_48 = arith.constant 8 : i32
      %81 = arith.addi %63, %c8_i32_48 : i32
      %c16_i32_49 = arith.constant 16 : i32
      %82 = arith.cmpi slt, %81, %c16_i32_49 : i32
      %83 = arith.extui %82 : i1 to i32
      %c0_i32_50 = arith.constant 0 : i32
      %84 = arith.cmpi ne, %83, %c0_i32_50 : i32
      scf.if %84 {
        %c8_i32_51 = arith.constant 8 : i32
        %85 = arith.addi %63, %c8_i32_51 : i32
        %86 = arith.addi %0, %85 : i32
        %87 = arith.index_cast %86 : i32 to index
        %88 = memref.load %arg1[%87] : memref<16xi32, #tpu.memory_space<smem>>
        %c0_i32_52 = arith.constant 0 : i32
        %89 = tpu.memref_slice %arg2[%88, %c0_i32_52] : memref<64x32xf32, #tpu.memory_space<any>> -> memref<1x32xf32, #tpu.memory_space<any>>
        %c0_i32_53 = arith.constant 0 : i32
        %90 = tpu.memref_slice %arg4[%85, %c0_i32_53] : memref<16x32xf32, #tpu.memory_space<vmem>> -> memref<1x32xf32, #tpu.memory_space<vmem>>
        %91 = tpu.memref_slice %arg5[%73] : memref<8x!tpu.dma_semaphore, #tpu.memory_space<semaphore_mem>> -> memref<1x!tpu.dma_semaphore, #tpu.memory_space<semaphore_mem>>
        %92 = tpu.memref_squeeze %91 : memref<1x!tpu.dma_semaphore, #tpu.memory_space<semaphore_mem>> -> memref<!tpu.dma_semaphore, #tpu.memory_space<semaphore_mem>>
        tpu.enqueue_dma source(%89 : memref<1x32xf32, #tpu.memory_space<any>>) target(%90 : memref<1x32xf32, #tpu.memory_space<vmem>>) target_semaphore(%92 : memref<!tpu.dma_semaphore, #tpu.memory_space<semaphore_mem>>)
      } else {
      }
    }
    %c16_i32_35 = arith.constant 16 : i32
    %c0 = arith.constant 0 : index
    %c0_36 = arith.constant 0 : index
    %58 = vector.load %arg4[%c0, %c0_36] : memref<16x32xf32, #tpu.memory_space<vmem>>, vector<16x32xf32>
    %cst = arith.constant 5.65685415 : f32
    %59 = vector.broadcast %cst : f32 to vector<16x32xf32>
    %60 = arith.mulf %58, %59 : vector<16x32xf32>
    %c0_37 = arith.constant 0 : index
    %c0_38 = arith.constant 0 : index
    %61 = vector.load %arg3[%c0_37, %c0_38] : memref<16x32xf32, #tpu.memory_space<vmem>>, vector<16x32xf32>
    tpu.vector_store %arg3[%c0_37, %c0_38], %60 {strides = array<i32>} : memref<16x32xf32, #tpu.memory_space<vmem>>, vector<16x32xf32>,
    return
  }
  func.func @transform_1(%arg0: i32, %arg1: memref<16xi32, #tpu.memory_space<smem>>) -> (i32, i32) {
    %c0_i32 = arith.constant 0 : i32
    %c0_i32_0 = arith.constant 0 : i32
    return %arg0, %c0_i32 : i32, i32
  }
}

</mosaic_0001>

<bundles_post_ra>
// kernel: tpu_custom_call.1
= control target key start
LH: loop header
LB: loop body
LE: loop exit
PB: predicated region body
PF: predicated region fallthrough
CT: control target
= control target key end

     0   :  { %s608_s12 = smov [#allocation5]   ;;  %s660_s0 = inlined_call_operand.vmem [shape: s32[16], index: 0, kind: input, shape index: {}]   ;;  %s661_s1 = inlined_call_operand.vmem [shape: f32[64,32], index: 1, kind: input, shape index: {}]   ;;  %s662_s2 = inlined_call_operand.hbm [shape: f32[16,32], index: 2, kind: output, shape index: {}]  }
   0x1   :  { %s8_s11 = sshll.u32 %s660_s0, 4  ;;  %s9_s11 = int_to_ptr.vmem [resolvable:$true] %s8_s11 }
   0x2   :  { %11 = dma.vmem_to_smem %s9_s11, 16, %s608_s12, [#allocation4] }
   0x3   :  { %598 = dma.done.wait [#allocation4], 16 }
   0x4   :  { %599 = vsyncadd [#allocation4], 4294967280 }
   0x5   :  { %14 = sfence }
   0x6   :  { %15 = vsyncpa [#allocation7], 0  ;;  %s17_s13 = sld [smem:[#allocation5]] }
   0xc   :  { %s18_s16 = scalar_lea.vmem %s661_s1, %s17_s13 }
   0xd   :  { %v33_v0 = vld [vmem:[%s18_s16] sm:$0x1] }
   0xe   :  { %34 = vst [vmem:[#allocation2] sm:$0x1] %v33_v0 }
   0xf   :  { %52 = vsyncadd [#allocation3], 16  ;;  %s526_s17 = sld [smem:[#allocation5 + $0x1]] }
  0x15   :  { %s55_s0 = scalar_lea.vmem %s661_s1, %s526_s17 }
  0x16   :  { %v72_v1 = vld [vmem:[%s55_s0] sm:$0x1] }
  0x17   :  { %73 = vst [vmem:[#allocation2 + $0x1] sm:$0x1] %v72_v1 }
  0x18   :  { %91 = vsyncadd [#allocation3 + $0x1], 16  ;;  %s527_s20 = sld [smem:[#allocation5 + $0x2]] }
  0x1e   :  { %s94_s23 = scalar_lea.vmem %s661_s1, %s527_s20 }
  0x1f   :  { %v111_v2 = vld [vmem:[%s94_s23] sm:$0x1] }
  0x20   :  { %112 = vst [vmem:[#allocation2 + $0x2] sm:$0x1] %v111_v2 }
  0x21   :  { %130 = vsyncadd [#allocation3 + $0x2], 16  ;;  %s528_s24 = sld [smem:[#allocation5 + $0x3]] }
  0x27   :  { %s133_s27 = scalar_lea.vmem %s661_s1, %s528_s24 }
  0x28   :  { %v150_v3 = vld [vmem:[%s133_s27] sm:$0x1] }
  0x29   :  { %151 = vst [vmem:[#allocation2 + $0x3] sm:$0x1] %v150_v3 }
  0x2a   :  { %169 = vsyncadd [#allocation3 + $0x3], 16  ;;  %s529_s28 = sld [smem:[#allocation5 + $0x4]] }
  0x30   :  { %s172_s3 = scalar_lea.vmem %s661_s1, %s529_s28 }
  0x31   :  { %v189_v4 = vld [vmem:[%s172_s3] sm:$0x1] }
  0x32   :  { %190 = vst [vmem:[#allocation2 + $0x4] sm:$0x1] %v189_v4 }
  0x33   :  { %208 = vsyncadd [#allocation3 + $0x4], 16  ;;  %s530_s4 = sld [smem:[#allocation5 + $0x5]] }
  0x39   :  { %s211_s7 = scalar_lea.vmem %s661_s1, %s530_s4 }
  0x3a   :  { %v228_v5 = vld [vmem:[%s211_s7] sm:$0x1] }
  0x3b   :  { %229 = vst [vmem:[#allocation2 + $0x5] sm:$0x1] %v228_v5 }
  0x3c   :  { %247 = vsyncadd [#allocation3 + $0x5], 16  ;;  %s531_s8 = sld [smem:[#allocation5 + $0x6]] }
  0x42   :  { %s250_s11 = scalar_lea.vmem %s661_s1, %s531_s8 }
  0x43   :  { %v267_v6 = vld [vmem:[%s250_s11] sm:$0x1] }
  0x44   :  { %268 = vst [vmem:[#allocation2 + $0x6] sm:$0x1] %v267_v6 }
  0x45   :  { %286 = vsyncadd [#allocation3 + $0x6], 16  ;;  %s532_s12 = sld [smem:[#allocation5 + $0x7]] }
  0x4b   :  { %s289_s15 = scalar_lea.vmem %s661_s1, %s532_s12 }
  0x4c   :  { %v306_v7 = vld [vmem:[%s289_s15] sm:$0x1] }
  0x4d   :  { %307 = vst [vmem:[#allocation2 + $0x7] sm:$0x1] %v306_v7 }
  0x4e   :  { %325 = vsyncadd [#allocation3 + $0x7], 16  ;;  %s604_s16 = smov 0  }
  0x4f LB: > { %p332_p0 = scmp.lt.s32.totalorder %s606_s16, 0  ;;  %s333_s17 = ssub.s32 0, %s606_s16  ;;  %s606_s16 = sphi %s604_s16, %s331_s16  }
  0x50   : > { %s533_s18 = smin.u32 %s606_s16, %s333_s17 }
  0x51   : > { %s335_s19 = sand.u32 7, %s533_s18  }
  0x52   : > { %s336_s0 = ssub.s32 0, %s335_s19 }
  0x53   : > { %s664_s0 = smov (!%p332_p0, %s336_s0), %s335_s19 }
  0x54   : > { %p535_p1 = scmp.lt.s32.totalorder %s664_s0, 0  ;;  %s342_s20 = sadd.s32 8, %s664_s0 }
  0x56   : > { %s666_s20 = smov (!%p535_p1, %s342_s20), %s664_s0 }
  0x57   : > { %s346_s21 = scalar_lea.sflag [#allocation3], %s666_s20 }
  0x58   : > { %600 = dma.done.wait %s346_s21, 16 }
  0x59   : > { %601 = vsyncadd %s346_s21, 4294967280  ;;  %s350_s22 = sadd.s32 8, %s606_s16 }
  0x5a   : > { %p536_p2 = scmp.ge.s32.totalorder %s350_s22, 16 }
  0x5b   : > { %s356_s23 = sld [smem:[#allocation5 + %s350_s22]] (!%p536_p2)  ;;  %s483_s27 = scalar_lea.vmem (!%p536_p2), [#allocation2], %s606_s16 }
  0x5c   : > { %354 = sbr.rel (%p536_p2) target bundleno = 101 (0x65), region = 252 }
  0x61   : > { %s357_s26 = scalar_lea.vmem %s661_s1, %s356_s23 }
  0x62   : > { %v373_v8 = vld [vmem:[%s357_s26] sm:$0x1] }
  0x63   : > { %537 = vst [vmem:[%s483_s27 + $0x8] sm:$0x1] %v373_v8 }
  0x64   : > { %392 = vsyncadd %s346_s21, 16 }
  0x65 PF: > { %s331_s16 = sadd.s32 1, %s606_s16  }
  0x66   : > { %p328_p3 = scmp.ge.s32.totalorder %s331_s16, 16  }
  0x67   :  { %vm397_vm0 = vcmask (%p328_p3), 261120   ;;  %s406_s30 = sshll.u32 (%p328_p3), %s662_s2, 4  ;;  %s609_s3 = smov (%p328_p3), [#allocation6]   ;;  %s407_s30 = int_to_ptr.hbm [resolvable:$true] %s406_s30 }
  0x68   :  { %330 = sbr.rel (!%p328_p3) target bundleno = 79 (0x4f), region = 369  ;;  %s404_s4 = sshll.u32 (%p328_p3), %s609_s3, 4  ;;  %s405_s4 = int_to_ptr.vmem [resolvable:$true] %s404_s4 }
  0x69   :  { %s610_s5 = smov (%p328_p3), 128   ;;  %s611_s6 = smov (%p328_p3), 8  }
  0x6a   :  { %v393_v9 = vld [vmem:[#allocation2] sm:$0xff] (%p328_p3)  ;;  %v394_v10 = vld [vmem:[#allocation2 + $0x8] sm:$0xff] (%p328_p3) }
  0x6b   :  { %v395_v11 = vmul.f32 (%p328_p3), 5.656854, %v393_v9  ;;  %v396_v12 = vmul.f32 (%p328_p3), 5.656854, %v394_v10 }
  0x6d   :  { %398 = vst.msk [vmem:[#allocation6] sm:$0xff] %vm397_vm0, %v395_v11 }
  0x6e   :  { %399 = vst.msk [vmem:[#allocation6 + $0x8] sm:$0xff] %vm397_vm0, %v396_v12 }
  0x6f   :  { %412 = dma.vmem_to_hbm [thread:$0]  %s405_s4, 256, %s407_s30, [#allocation7], %s610_s5, %s610_s5, %s611_s6  }
  0x70   :  { %602 = dma.done.wait [#allocation7], 256  }
  0x71   :  { %603 = vsyncadd [#allocation7], 4294967040 }
  0x72   :  { %417 = vsyncpa [#allocation7], 1 }
  0x73   :  { %418 = vsyncmov [#allocation3] }
  0x76   :  { %s419_s1 = vpop.sfrf %418 }
  0x77   :  { %p538_p4 = scmp.ne.s32.totalorder %s419_s1, 0 }
  0x79   :  { %423 = shalt.err (%p538_p4)  }
  0x7a   :  { %425 = vsyncmov [#allocation3 + $0x1] }
  0x7d   :  { %s426_s2 = vpop.sfrf %425 }
  0x7e   :  { %p539_p5 = scmp.ne.s32.totalorder %s426_s2, 0 }
  0x80   :  { %430 = shalt.err (%p539_p5)  }
  0x81   :  { %432 = vsyncmov [#allocation3 + $0x2] }
  0x84   :  { %s433_s7 = vpop.sfrf %432 }
  0x85   :  { %p540_p6 = scmp.ne.s32.totalorder %s433_s7, 0 }
  0x87   :  { %437 = shalt.err (%p540_p6)  }
  0x88   :  { %439 = vsyncmov [#allocation3 + $0x3] }
  0x8b   :  { %s440_s8 = vpop.sfrf %439 }
  0x8c   :  { %p541_p7 = scmp.ne.s32.totalorder %s440_s8, 0 }
  0x8e   :  { %444 = shalt.err (%p541_p7)  }
  0x8f   :  { %446 = vsyncmov [#allocation3 + $0x4] }
  0x92   :  { %s447_s9 = vpop.sfrf %446 }
  0x93   :  { %p542_p8 = scmp.ne.s32.totalorder %s447_s9, 0 }
  0x95   :  { %451 = shalt.err (%p542_p8)  }
  0x96   :  { %453 = vsyncmov [#allocation3 + $0x5] }
  0x99   :  { %s454_s10 = vpop.sfrf %453 }
  0x9a   :  { %p543_p9 = scmp.ne.s32.totalorder %s454_s10, 0 }
  0x9c   :  { %458 = shalt.err (%p543_p9)  }
  0x9d   :  { %460 = vsyncmov [#allocation3 + $0x6] }
  0xa0   :  { %s461_s11 = vpop.sfrf %460 }
  0xa1   :  { %p544_p10 = scmp.ne.s32.totalorder %s461_s11, 0 }
  0xa3   :  { %465 = shalt.err (%p544_p10)  }
  0xa4   :  { %467 = vsyncmov [#allocation3 + $0x7] }
  0xa7   :  { %s468_s12 = vpop.sfrf %467 }
  0xa8   :  { %p545_p11 = scmp.ne.s32.totalorder %s468_s12, 0 }
  0xaa   :  { %472 = shalt.err (%p545_p11)  }

</bundles_post_ra>
